<compile_context>
chip_gen: v7x
topology: tpu7x:2x2x1
jax: 0.10.0
libtpu: 0.0.40
codegen_flags: <defaults>
</compile_context>

<pallas_src>
import functools

import jax
import jax.numpy as jnp
from jax.experimental import pallas as pl
from jax.experimental.pallas import tpu as pltpu


def _round_up(x, m):
    return (x + m - 1) // m * m


# ---------------------------------------------------------------------------
# Fused kernel: feature banks (block-diag matmul) -> interleaved RNN -> pool
# ---------------------------------------------------------------------------
def _fused_chain_kernel(xv_ref, wv_ref, bv_ref, mv_ref,
                        xe_ref, we_ref, be_ref, me_ref,
                        whh_ref, brnn_ref, o_ref,
                        *, Pv, Pe, N, H, pooling):
    # Vertex side: one block-diagonal matmul covers all positions & features.
    yv = jnp.maximum(
        jnp.dot(xv_ref[...], wv_ref[...], preferred_element_type=jnp.float32)
        + bv_ref[...], 0.0)                                   # (Pv*N, Fv*H)
    # mv = tile(Wih^T, (Fv,1)) / Fv : folds mean-over-features + input proj.
    pv = (jnp.dot(yv, mv_ref[...], preferred_element_type=jnp.float32)
          + brnn_ref[...])                                    # (Pv*N, H)

    # Edge side.
    ye = jnp.maximum(
        jnp.dot(xe_ref[...], we_ref[...], preferred_element_type=jnp.float32)
        + be_ref[...], 0.0)                                   # (Pe*N, Fe*H)
    pe = (jnp.dot(ye, me_ref[...], preferred_element_type=jnp.float32)
          + brnn_ref[...])                                    # (Pe*N, H)

    # RNN over the interleaved sequence [v0, e0, v1, e1, ...], fully unrolled.
    T = Pv + Pe
    whh = whh_ref[...]                                        # (H, H) = Whh^T
    h = jnp.zeros((N, H), jnp.float32)
    acc = jnp.zeros((N, H), jnp.float32)
    for t in range(T):                                        # static unroll
        p = t // 2
        if t % 2 == 0:
            x_proj = pv[p * N:(p + 1) * N, :]
        else:
            x_proj = pe[p * N:(p + 1) * N, :]
        h = jnp.tanh(x_proj
                     + jnp.dot(h, whh, preferred_element_type=jnp.float32))
        if pooling != "last":
            acc = acc + h

    if pooling == "last":
        o_ref[...] = h
    else:
        o_ref[...] = acc * jnp.float32(1.0 / T)


# ---------------------------------------------------------------------------
# Wrapper-side packing (done once per call; pure layout, no compute hoisting)
# ---------------------------------------------------------------------------
def _pack_side(feat_list, Ws, bs, wih_t):
    """feat_list: list over P positions of lists over F features of (N, d_j).

    Returns X (P*N, D), block-diag W (D, F*H), bias (1, F*H),
    M = tile(Wih^T,(F,1))/F (F*H, H), and P.
    Each d_j is zero-padded to a multiple of 8 (sublane-aligned K blocks).
    """
    P = len(feat_list)
    F = len(Ws)
    H = wih_t.shape[0]
    d_pad = [_round_up(W.shape[1], 8) for W in Ws]
    D = sum(d_pad)

    rows = []
    for pos in feat_list:
        cols = [jnp.pad(x, ((0, 0), (0, d_pad[j] - x.shape[1])))
                for j, x in enumerate(pos)]
        rows.append(jnp.concatenate(cols, axis=1))
    X = jnp.concatenate(rows, axis=0)                          # (P*N, D)

    Wblk = jnp.zeros((D, F * H), jnp.float32)
    off = 0
    for j, W in enumerate(Ws):
        Wt = jnp.transpose(W)                                  # (d_j, H)
        Wblk = Wblk.at[off:off + W.shape[1], j * H:(j + 1) * H].set(Wt)
        off += d_pad[j]
    Bcat = jnp.concatenate([b.reshape(1, H) for b in bs], axis=1)  # (1, F*H)
    M = jnp.tile(wih_t, (F, 1)) / jnp.float32(F)               # (F*H, H)
    return X, Wblk, Bcat, M, P


def chain_encoder_forward(v_features, e_features, params, pooling="last"):
    H = params["w_hh"].shape[0]
    N = v_features[0][0].shape[0]

    wih_t = jnp.transpose(params["w_ih"])                      # kernel: x @ Wih^T
    whh_t = jnp.transpose(params["w_hh"])
    brnn = (params["b_ih"] + params["b_hh"]).reshape(1, H)

    xv, wv, bv, mv, Pv = _pack_side(v_features, params["v_W"], params["v_b"], wih_t)
    xe, we, be, me, Pe = _pack_side(e_features, params["e_W"], params["e_b"], wih_t)

    kernel = functools.partial(_fused_chain_kernel,
                               Pv=Pv, Pe=Pe, N=N, H=H, pooling=pooling)

    def full(shape):
        nd = len(shape)
        return pl.BlockSpec(shape, lambda i, _nd=nd: (0,) * _nd)

    return pl.pallas_call(
        kernel,
        out_shape=jax.ShapeDtypeStruct((N, H), jnp.float32),
        grid_spec=pltpu.PrefetchScalarGridSpec(
            num_scalar_prefetch=0,
            grid=(1,),                         # single step; all data resident
            in_specs=[full(xv.shape), full(wv.shape), full(bv.shape), full(mv.shape),
                      full(xe.shape), full(we.shape), full(be.shape), full(me.shape),
                      full(whh_t.shape), full(brnn.shape)],
            out_specs=full((N, H)),
        ),
        compiler_params=pltpu.CompilerParams(
            dimension_semantics=("arbitrary",)),
    )(xv, wv, bv, mv, xe, we, be, me, whh_t, brnn)


# ---------------------------------------------------------------------------
# Pure-JAX reference (mirrors the PyTorch forward exactly)
# ---------------------------------------------------------------------------
def reference_forward(v_features, e_features, params, pooling="last"):
    def enc_side(feats, Ws, bs):
        out = []
        for pos in feats:
            acc = None
            for x, W, b in zip(pos, Ws, bs):
                y = jnp.maximum(x @ W.T + b, 0.0)
                acc = y if acc is None else acc + y
            out.append(acc / len(pos))
        return out

    v_encs = enc_side(v_features, params["v_W"], params["v_b"])
    e_encs = enc_side(e_features, params["e_W"], params["e_b"])
    T = len(v_encs) + len(e_encs)
    combined = [None] * T
    combined[::2] = v_encs
    combined[1::2] = e_encs
    seq = jnp.stack(combined, 0)

    N, H = seq.shape[1], params["w_hh"].shape[0]
    h = jnp.zeros((N, H), jnp.float32)
    outs = []
    for t in range(T):
        h = jnp.tanh(seq[t] @ params["w_ih"].T + params["b_ih"]
                     + h @ params["w_hh"].T + params["b_hh"])
        outs.append(h)
    out = jnp.stack(outs, 0)
    return out[-1] if pooling == "last" else jnp.mean(out, axis=0)


# ---------------------------------------------------------------------------
# Main: deterministic params + inputs, run, check, print KERNEL_OK
# ---------------------------------------------------------------------------
if __name__ == "__main__":
    # ChainEncoder config
    v_feature_lengths = [5, 7]          # two vertex feature types
    e_feature_lengths = [3, 6, 4]       # three edge feature types
    out_length = 32                     # hidden / encoding size H
    num_vertices = 3
    num_edges = 2                       # chain: v e v e v  -> seq_len = 5
    N = 8                               # batch size
    H = out_length
    pooling = "last"                    # module's 'last' branch

    key = jax.random.PRNGKey(0)

    def uniform_init(key, shape, fan_in):
        bound = 1.0 / jnp.sqrt(jnp.float32(fan_in))
        return jax.random.uniform(key, shape, jnp.float32, -bound, bound)

    # FeatureTransformer params (nn.Linear layout: W (out, in), b (out,))
    params = {"v_W": [], "v_b": [], "e_W": [], "e_b": []}
    for d_in in v_feature_lengths:
        key, k1, k2 = jax.random.split(key, 3)
        params["v_W"].append(uniform_init(k1, (H, d_in), d_in))
        params["v_b"].append(uniform_init(k2, (H,), d_in))
    for d_in in e_feature_lengths:
        key, k1, k2 = jax.random.split(key, 3)
        params["e_W"].append(uniform_init(k1, (H, d_in), d_in))
        params["e_b"].append(uniform_init(k2, (H,), d_in))

    # nn.RNN params (tanh, num_layers=1)
    key, k1, k2, k3, k4 = jax.random.split(key, 5)
    params["w_ih"] = uniform_init(k1, (H, H), H)
    params["w_hh"] = uniform_init(k2, (H, H), H)
    params["b_ih"] = uniform_init(k3, (H,), H)
    params["b_hh"] = uniform_init(k4, (H,), H)

    # Inputs: v_features[i][j] is (N, v_feature_lengths[j]); e similarly.
    v_features, e_features = [], []
    for _ in range(num_vertices):
        pos = []
        for d_in in v_feature_lengths:
            key, k = jax.random.split(key)
            pos.append(jax.random.normal(k, (N, d_in), jnp.float32))
        v_features.append(pos)
    for _ in range(num_edges):
        pos = []
        for d_in in e_feature_lengths:
            key, k = jax.random.split(key)
            pos.append(jax.random.normal(k, (N, d_in), jnp.float32))
        e_features.append(pos)

    out = chain_encoder_forward(v_features, e_features, params, pooling=pooling)
    out = jax.block_until_ready(out)

    ref = reference_forward(v_features, e_features, params, pooling=pooling)
    assert out.shape == (N, H)
    assert jnp.allclose(out, ref, rtol=1e-5, atol=1e-5), "mismatch vs reference"

    # TODO(synk): LSTM branch (rnn_type='LSTM') not implemented; only the 'RNN'
    # configuration of ChainEncoder is reproduced here.
    print("KERNEL_OK")
</pallas_src>

<mosaic_0001>
module attributes {stable_mosaic.version = 11 : i64} {
  func.func @_fused_chain_kernel(%arg0: i32, %arg1: memref<24x16xf32, #tpu.memory_space<vmem>>, %arg2: memref<16x64xf32, #tpu.memory_space<vmem>>, %arg3: memref<1x64xf32, #tpu.memory_space<vmem>>, %arg4: memref<64x32xf32, #tpu.memory_space<vmem>>, %arg5: memref<16x24xf32, #tpu.memory_space<vmem>>, %arg6: memref<24x96xf32, #tpu.memory_space<vmem>>, %arg7: memref<1x96xf32, #tpu.memory_space<vmem>>, %arg8: memref<96x32xf32, #tpu.memory_space<vmem>>, %arg9: memref<32x32xf32, #tpu.memory_space<vmem>>, %arg10: memref<1x32xf32, #tpu.memory_space<vmem>>, %arg11: memref<8x32xf32, #tpu.memory_space<vmem>>) attributes {dimension_semantics = [#tpu.dimension_semantics<arbitrary>], iteration_bounds = array<i64: 1>, scalar_prefetch = 0 : i64, scratch_operands = 0 : i64, tpu.core_type = #tpu.core_type<tc>, window_params = [{pipeline_mode = #tpu.pipeline_mode<synchronous>, transform_indices = @transform_0, window_bounds = array<i64: 24, 16>}, {pipeline_mode = #tpu.pipeline_mode<synchronous>, transform_indices = @transform_1, window_bounds = array<i64: 16, 64>}, {pipeline_mode = #tpu.pipeline_mode<synchronous>, transform_indices = @transform_2, window_bounds = array<i64: 1, 64>}, {pipeline_mode = #tpu.pipeline_mode<synchronous>, transform_indices = @transform_3, window_bounds = array<i64: 64, 32>}, {pipeline_mode = #tpu.pipeline_mode<synchronous>, transform_indices = @transform_4, window_bounds = array<i64: 16, 24>}, {pipeline_mode = #tpu.pipeline_mode<synchronous>, transform_indices = @transform_5, window_bounds = array<i64: 24, 96>}, {pipeline_mode = #tpu.pipeline_mode<synchronous>, transform_indices = @transform_6, window_bounds = array<i64: 1, 96>}, {pipeline_mode = #tpu.pipeline_mode<synchronous>, transform_indices = @transform_7, window_bounds = array<i64: 96, 32>}, {pipeline_mode = #tpu.pipeline_mode<synchronous>, transform_indices = @transform_8, window_bounds = array<i64: 32, 32>}, {pipeline_mode = #tpu.pipeline_mode<synchronous>, transform_indices = @transform_9, window_bounds = array<i64: 1, 32>}, {pipeline_mode = #tpu.pipeline_mode<synchronous>, transform_indices = @transform_10, window_bounds = array<i64: 8, 32>}]} {
    %c0 = arith.constant 0 : index
    %c0_0 = arith.constant 0 : index
    %0 = vector.load %arg1[%c0, %c0_0] : memref<24x16xf32, #tpu.memory_space<vmem>>, vector<24x16xf32>
    %c0_1 = arith.constant 0 : index
    %c0_2 = arith.constant 0 : index
    %1 = vector.load %arg2[%c0_1, %c0_2] : memref<16x64xf32, #tpu.memory_space<vmem>>, vector<16x64xf32>
    %cst = arith.constant dense<0.000000e+00> : vector<24x64xf32>
    %2 = tpu.matmul %0, %1, %cst {dimension_numbers = #tpu.dot_dimension_numbers<[1], [0], [0], [1], [0, 0, 1, 1], [], []>} : vector<24x16xf32>, vector<16x64xf32>, vector<24x64xf32> -> vector<24x64xf32>
    %c0_3 = arith.constant 0 : index
    %c0_4 = arith.constant 0 : index
    %3 = vector.load %arg3[%c0_3, %c0_4] : memref<1x64xf32, #tpu.memory_space<vmem>>, vector<1x64xf32>
    %4 = vector.broadcast %3 : vector<1x64xf32> to vector<24x64xf32>
    %5 = arith.addf %2, %4 : vector<24x64xf32>
    %cst_5 = arith.constant 0.000000e+00 : f32
    %6 = vector.broadcast %cst_5 : f32 to vector<24x64xf32>
    %7 = arith.maximumf %5, %6 : vector<24x64xf32>
    %c0_6 = arith.constant 0 : index
    %c0_7 = arith.constant 0 : index
    %8 = vector.load %arg4[%c0_6, %c0_7] : memref<64x32xf32, #tpu.memory_space<vmem>>, vector<64x32xf32>
    %cst_8 = arith.constant dense<0.000000e+00> : vector<24x32xf32>
    %9 = tpu.matmul %7, %8, %cst_8 {dimension_numbers = #tpu.dot_dimension_numbers<[1], [0], [0], [1], [0, 0, 1, 1], [], []>} : vector<24x64xf32>, vector<64x32xf32>, vector<24x32xf32> -> vector<24x32xf32>
    %c0_9 = arith.constant 0 : index
    %c0_10 = arith.constant 0 : index
    %10 = vector.load %arg10[%c0_9, %c0_10] : memref<1x32xf32, #tpu.memory_space<vmem>>, vector<1x32xf32>
    %11 = vector.broadcast %10 : vector<1x32xf32> to vector<24x32xf32>
    %12 = arith.addf %9, %11 : vector<24x32xf32>
    %c0_11 = arith.constant 0 : index
    %c0_12 = arith.constant 0 : index
    %13 = vector.load %arg5[%c0_11, %c0_12] : memref<16x24xf32, #tpu.memory_space<vmem>>, vector<16x24xf32>
    %c0_13 = arith.constant 0 : index
    %c0_14 = arith.constant 0 : index
    %14 = vector.load %arg6[%c0_13, %c0_14] : memref<24x96xf32, #tpu.memory_space<vmem>>, vector<24x96xf32>
    %cst_15 = arith.constant dense<0.000000e+00> : vector<16x96xf32>
    %15 = tpu.matmul %13, %14, %cst_15 {dimension_numbers = #tpu.dot_dimension_numbers<[1], [0], [0], [1], [0, 0, 1, 1], [], []>} : vector<16x24xf32>, vector<24x96xf32>, vector<16x96xf32> -> vector<16x96xf32>
    %c0_16 = arith.constant 0 : index
    %c0_17 = arith.constant 0 : index
    %16 = vector.load %arg7[%c0_16, %c0_17] : memref<1x96xf32, #tpu.memory_space<vmem>>, vector<1x96xf32>
    %17 = vector.broadcast %16 : vector<1x96xf32> to vector<16x96xf32>
    %18 = arith.addf %15, %17 : vector<16x96xf32>
    %cst_18 = arith.constant 0.000000e+00 : f32
    %19 = vector.broadcast %cst_18 : f32 to vector<16x96xf32>
    %20 = arith.maximumf %18, %19 : vector<16x96xf32>
    %c0_19 = arith.constant 0 : index
    %c0_20 = arith.constant 0 : index
    %21 = vector.load %arg8[%c0_19, %c0_20] : memref<96x32xf32, #tpu.memory_space<vmem>>, vector<96x32xf32>
    %cst_21 = arith.constant dense<0.000000e+00> : vector<16x32xf32>
    %22 = tpu.matmul %20, %21, %cst_21 {dimension_numbers = #tpu.dot_dimension_numbers<[1], [0], [0], [1], [0, 0, 1, 1], [], []>} : vector<16x96xf32>, vector<96x32xf32>, vector<16x32xf32> -> vector<16x32xf32>
    %c0_22 = arith.constant 0 : index
    %c0_23 = arith.constant 0 : index
    %23 = vector.load %arg10[%c0_22, %c0_23] : memref<1x32xf32, #tpu.memory_space<vmem>>, vector<1x32xf32>
    %24 = vector.broadcast %23 : vector<1x32xf32> to vector<16x32xf32>
    %25 = arith.addf %22, %24 : vector<16x32xf32>
    %c0_24 = arith.constant 0 : index
    %c0_25 = arith.constant 0 : index
    %26 = vector.load %arg9[%c0_24, %c0_25] : memref<32x32xf32, #tpu.memory_space<vmem>>, vector<32x32xf32>
    %cst_26 = arith.constant 0.000000e+00 : f32
    %27 = vector.broadcast %cst_26 : f32 to vector<8x32xf32>
    %28 = vector.extract_strided_slice %12 {offsets = [0, 0], sizes = [8, 32], strides = [1, 1]} : vector<24x32xf32> to vector<8x32xf32>
    %cst_27 = arith.constant dense<0.000000e+00> : vector<8x32xf32>
    %29 = tpu.matmul %27, %26, %cst_27 {dimension_numbers = #tpu.dot_dimension_numbers<[1], [0], [0], [1], [0, 0, 1, 1], [], []>} : vector<8x32xf32>, vector<32x32xf32>, vector<8x32xf32> -> vector<8x32xf32>
    %30 = arith.addf %28, %29 : vector<8x32xf32>
    %31 = math.tanh %30 : vector<8x32xf32>
    %32 = vector.extract_strided_slice %25 {offsets = [0, 0], sizes = [8, 32], strides = [1, 1]} : vector<16x32xf32> to vector<8x32xf32>
    %cst_28 = arith.constant dense<0.000000e+00> : vector<8x32xf32>
    %33 = tpu.matmul %31, %26, %cst_28 {dimension_numbers = #tpu.dot_dimension_numbers<[1], [0], [0], [1], [0, 0, 1, 1], [], []>} : vector<8x32xf32>, vector<32x32xf32>, vector<8x32xf32> -> vector<8x32xf32>
    %34 = arith.addf %32, %33 : vector<8x32xf32>
    %35 = math.tanh %34 : vector<8x32xf32>
    %36 = vector.extract_strided_slice %12 {offsets = [8, 0], sizes = [8, 32], strides = [1, 1]} : vector<24x32xf32> to vector<8x32xf32>
    %cst_29 = arith.constant dense<0.000000e+00> : vector<8x32xf32>
    %37 = tpu.matmul %35, %26, %cst_29 {dimension_numbers = #tpu.dot_dimension_numbers<[1], [0], [0], [1], [0, 0, 1, 1], [], []>} : vector<8x32xf32>, vector<32x32xf32>, vector<8x32xf32> -> vector<8x32xf32>
    %38 = arith.addf %36, %37 : vector<8x32xf32>
    %39 = math.tanh %38 : vector<8x32xf32>
    %40 = vector.extract_strided_slice %25 {offsets = [8, 0], sizes = [8, 32], strides = [1, 1]} : vector<16x32xf32> to vector<8x32xf32>
    %cst_30 = arith.constant dense<0.000000e+00> : vector<8x32xf32>
    %41 = tpu.matmul %39, %26, %cst_30 {dimension_numbers = #tpu.dot_dimension_numbers<[1], [0], [0], [1], [0, 0, 1, 1], [], []>} : vector<8x32xf32>, vector<32x32xf32>, vector<8x32xf32> -> vector<8x32xf32>
    %42 = arith.addf %40, %41 : vector<8x32xf32>
    %43 = math.tanh %42 : vector<8x32xf32>
    %44 = vector.extract_strided_slice %12 {offsets = [16, 0], sizes = [8, 32], strides = [1, 1]} : vector<24x32xf32> to vector<8x32xf32>
    %cst_31 = arith.constant dense<0.000000e+00> : vector<8x32xf32>
    %45 = tpu.matmul %43, %26, %cst_31 {dimension_numbers = #tpu.dot_dimension_numbers<[1], [0], [0], [1], [0, 0, 1, 1], [], []>} : vector<8x32xf32>, vector<32x32xf32>, vector<8x32xf32> -> vector<8x32xf32>
    %46 = arith.addf %44, %45 : vector<8x32xf32>
    %47 = math.tanh %46 : vector<8x32xf32>
    %c0_32 = arith.constant 0 : index
    %c0_33 = arith.constant 0 : index
    %48 = vector.load %arg11[%c0_32, %c0_33] : memref<8x32xf32, #tpu.memory_space<vmem>>, vector<8x32xf32>
    tpu.vector_store %arg11[%c0_32, %c0_33], %47 {strides = array<i32>} : memref<8x32xf32, #tpu.memory_space<vmem>>, vector<8x32xf32>,
    return
  }
  func.func @transform_0(%arg0: i32) -> (i32, i32) {
    %c0_i32 = arith.constant 0 : i32
    %c0_i32_0 = arith.constant 0 : i32
    %c0_i32_1 = arith.constant 0 : i32
    return %c0_i32, %c0_i32_0 : i32, i32
  }
  func.func @transform_1(%arg0: i32) -> (i32, i32) {
    %c0_i32 = arith.constant 0 : i32
    %c0_i32_0 = arith.constant 0 : i32
    %c0_i32_1 = arith.constant 0 : i32
    return %c0_i32, %c0_i32_0 : i32, i32
  }
  func.func @transform_2(%arg0: i32) -> (i32, i32) {
    %c0_i32 = arith.constant 0 : i32
    %c0_i32_0 = arith.constant 0 : i32
    %c0_i32_1 = arith.constant 0 : i32
    return %c0_i32, %c0_i32_0 : i32, i32
  }
  func.func @transform_3(%arg0: i32) -> (i32, i32) {
    %c0_i32 = arith.constant 0 : i32
    %c0_i32_0 = arith.constant 0 : i32
    %c0_i32_1 = arith.constant 0 : i32
    return %c0_i32, %c0_i32_0 : i32, i32
  }
  func.func @transform_4(%arg0: i32) -> (i32, i32) {
    %c0_i32 = arith.constant 0 : i32
    %c0_i32_0 = arith.constant 0 : i32
    %c0_i32_1 = arith.constant 0 : i32
    return %c0_i32, %c0_i32_0 : i32, i32
  }
  func.func @transform_5(%arg0: i32) -> (i32, i32) {
    %c0_i32 = arith.constant 0 : i32
    %c0_i32_0 = arith.constant 0 : i32
    %c0_i32_1 = arith.constant 0 : i32
    return %c0_i32, %c0_i32_0 : i32, i32
  }
  func.func @transform_6(%arg0: i32) -> (i32, i32) {
    %c0_i32 = arith.constant 0 : i32
    %c0_i32_0 = arith.constant 0 : i32
    %c0_i32_1 = arith.constant 0 : i32
    return %c0_i32, %c0_i32_0 : i32, i32
  }
  func.func @transform_7(%arg0: i32) -> (i32, i32) {
    %c0_i32 = arith.constant 0 : i32
    %c0_i32_0 = arith.constant 0 : i32
    %c0_i32_1 = arith.constant 0 : i32
    return %c0_i32, %c0_i32_0 : i32, i32
  }
  func.func @transform_8(%arg0: i32) -> (i32, i32) {
    %c0_i32 = arith.constant 0 : i32
    %c0_i32_0 = arith.constant 0 : i32
    %c0_i32_1 = arith.constant 0 : i32
    return %c0_i32, %c0_i32_0 : i32, i32
  }
  func.func @transform_9(%arg0: i32) -> (i32, i32) {
    %c0_i32 = arith.constant 0 : i32
    %c0_i32_0 = arith.constant 0 : i32
    %c0_i32_1 = arith.constant 0 : i32
    return %c0_i32, %c0_i32_0 : i32, i32
  }
  func.func @transform_10(%arg0: i32) -> (i32, i32) {
    %c0_i32 = arith.constant 0 : i32
    %c0_i32_0 = arith.constant 0 : i32
    %c0_i32_1 = arith.constant 0 : i32
    return %c0_i32, %c0_i32_0 : i32, i32
  }
}

</mosaic_0001>

<bundles_post_ra>
// kernel: tpu_custom_call.1
= control target key start
LH: loop header
LB: loop body
LE: loop exit
PB: predicated region body
PF: predicated region fallthrough
CT: control target
= control target key end

     0   :  { %v1157_v2 = vmov 0.0|0.0   ;;  %vm1158_vm0 = vmmov 0   ;;  %v1159_v4 = vmov 0.0   ;;  %vm48_vm1 = vcmask 130048   ;;  %s1402_s0 = inlined_call_operand.vmem [shape: f32[24,16], index: 0, kind: input, shape index: {}]   ;;  %s1403_s1 = inlined_call_operand.vmem [shape: f32[16,64], index: 1, kind: input, shape index: {}]   ;;  %s1404_s2 = inlined_call_operand.vmem [shape: f32[1,64], index: 2, kind: input, shape index: {}]   ;;  %s1405_s3 = inlined_call_operand.vmem [shape: f32[64,32], index: 3, kind: input, shape index: {}]   ;;  %s1406_s4 = inlined_call_operand.vmem [shape: f32[16,24], index: 4, kind: input, shape index: {}]   ;;  %s1407_s5 = inlined_call_operand.vmem [shape: f32[24,96], index: 5, kind: input, shape index: {}]   ;;  %s1408_s6 = inlined_call_operand.vmem [shape: f32[1,96], index: 6, kind: input, shape index: {}]   ;;  %s1409_s7 = inlined_call_operand.vmem [shape: f32[96,32], index: 7, kind: input, shape index: {}]   ;;  %s1410_s8 = inlined_call_operand.vmem [shape: f32[32,32], index: 8, kind: input, shape index: {}]   ;;  %s1411_s9 = inlined_call_operand.vmem [shape: f32[1,32], index: 9, kind: input, shape index: {}]   ;;  %s1412_s10 = inlined_call_operand.hbm [shape: f32[8,32], index: 10, kind: output, shape index: {}]  }
   0x1   :  { %v39_v0 = vld [vmem:[%s1403_s1] sm:$0xff]  ;;  %v40_v1 = vld [vmem:[%s1403_s1 + $0x8] sm:$0xff]  ;;  %1037 = vmatprep.subr.bf16.mxu0 %v1157_v2  ;;  %912 = vmatprep.mubr.msk.f32.mxu0 %vm1158_vm0, %v1159_v4  ;;  %v143_v7 = vld [vmem:[%s1405_s3 + $0x10] sm:$0xff] }
   0x2   :  { %v1038_v3 = vpack.c.bf16 %v40_v1, %v39_v0  ;;  %v141_v5 = vld [vmem:[%s1405_s3] sm:$0xff]  ;;  %1040 = vmatprep.subr.bf16.mxu1 %v1157_v2  ;;  %v142_v6 = vld [vmem:[%s1405_s3 + $0x8] sm:$0xff]  ;;  %v144_v8 = vld [vmem:[%s1405_s3 + $0x18] sm:$0xff]  ;;  %937 = vmatprep.mubr.msk.f32.mxu1 %vm1158_vm0, %v1159_v4 }
   0x3   :  { %v36_v9 = vld [vmem:[%s1402_s0] sm:$0xff]  ;;  %v1041_v10 = vpack.c.bf16 %v142_v6, %v141_v5 }
   0x4   :  { %1039 = vmatpush3.bf16.msra.mxu0 %v1038_v3 }
   0x5   :  { %15 = vsyncpa [#allocation3], 0  ;;  %1042 = vmatpush3.bf16.msra.mxu1 %v1041_v10  ;;  %v1044_v11 = vpack.c.bf16 %v144_v8, %v143_v7  ;;  %v145_v12 = vld [vmem:[%s1405_s3 + $0x20] sm:$0xff]  ;;  %v146_v13 = vld [vmem:[%s1405_s3 + $0x28] sm:$0xff]  ;;  %vm258_vm2 = vcmask 195584   ;;  %vm156_vm3 = vcmask 523264  }
   0x6   :  { %1043 = vmatprep.subr.bf16.mxu1 %v1157_v2  ;;  %v37_v14 = vld [vmem:[%s1402_s0 + $0x8] sm:$0xff]  ;;  %v1047_v15 = vpack.c.bf16 %v146_v13, %v145_v12  ;;  %v38_v16 = vld [vmem:[%s1402_s0 + $0x10] sm:$0xff]  ;;  %v148_v18 = vld [vmem:[%s1405_s3 + $0x38] sm:$0xff]  ;;  %vm354_vm4 = vcmask 785408   ;;  %vm440_vm5 = vcmask 261120  }
   0x7   :  { %913 = vmatmul.mubr.msk.f32.vlgmr.msra.gmra.mrb[0].mxu0 %vm48_vm1, %v36_v9  ;;  %v147_v17 = vld [vmem:[%s1405_s3 + $0x30] sm:$0xff]  ;;  %v248_v20 = vld [vmem:[%s1407_s5] sm:$0xff]  ;;  %v249_v21 = vld [vmem:[%s1407_s5 + $0x8] sm:$0xff] }
   0x8   :  { %915 = vmatprep.mubr.msk.f32.mxu0 %vm1158_vm0, %v1159_v4  ;;  %v1050_v19 = vpack.c.bf16 %v148_v18, %v147_v17  ;;  %v1052_v22 = vpack.c.bf16 %v249_v21, %v248_v20  ;;  %v250_v23 = vld [vmem:[%s1407_s5 + $0x10] sm:$0xff]  ;;  %v246_v24 = vld [vmem:[%s1406_s4] sm:$0xff]  ;;  %v247_v25 = vld [vmem:[%s1406_s4 + $0x8] sm:$0xff] }
   0x9   :  { %1045 = vmatpush3.bf16.msra.mxu1 %v1044_v11  ;;  %v342_v26 = vld [vmem:[%s1409_s7] sm:$0xff]  ;;  %v343_v27 = vld [vmem:[%s1409_s7 + $0x8] sm:$0xff]  ;;  %v344_v29 = vld [vmem:[%s1409_s7 + $0x10] sm:$0xff] }
   0xa   :  { %1046 = vmatprep.subr.bf16.mxu1 %v1157_v2  ;;  %1053 = vmatprep.subr.bf16.mxu0 %v1052_v22  ;;  %v1056_v28 = vpack.c.bf16 %v343_v27, %v342_v26  ;;  %v345_v30 = vld [vmem:[%s1409_s7 + $0x18] sm:$0xff]  ;;  %v346_v32 = vld [vmem:[%s1409_s7 + $0x20] sm:$0xff]  ;;  %v347_v33 = vld [vmem:[%s1409_s7 + $0x28] sm:$0xff] }
   0xb   :  { %916 = vmatmul.mubr.msk.f32.gmra.mrb[2].mxu0 %vm48_vm1, %v37_v14  ;;  %v1060_v31 = vpack.c.bf16 %v345_v30, %v344_v29  ;;  %v1064_v34 = vpack.c.bf16 %v347_v33, %v346_v32  ;;  %v348_v35 = vld [vmem:[%s1409_s7 + $0x30] sm:$0xff]  ;;  %v349_v36 = vld [vmem:[%s1409_s7 + $0x38] sm:$0xff]  ;;  %v350_v38 = vld [vmem:[%s1409_s7 + $0x40] sm:$0xff] }
   0xc   :  { %918 = vmatprep.mubr.msk.f32.mxu0 %vm1158_vm0, %v1159_v4  ;;  %1055 = vmatpush3.bf16.msra.mxu0 %v1052_v22  ;;  %v1068_v37 = vpack.c.bf16 %v349_v36, %v348_v35  ;;  %v351_v39 = vld [vmem:[%s1409_s7 + $0x48] sm:$0xff]  ;;  %v831_v41 = vld [vmem:[%s1404_s2] ss:$0 sm:$0xff]  ;;  %v438_v49 = vld [vmem:[%s1410_s8 + $0x10] sm:$0xff] }
   0xd   :  { %1048 = vmatpush3.bf16.msra.mxu1 %v1047_v15  ;;  %950 = vmatprep.subr.mxu0 %v250_v23  ;;  %v1072_v40 = vpack.c.bf16 %v351_v39, %v350_v38  ;;  %v436_v42 = vld [vmem:[%s1410_s8] sm:$0xff]  ;;  %v437_v43 = vld [vmem:[%s1410_s8 + $0x8] sm:$0xff]  ;;  %v439_v50 = vld [vmem:[%s1410_s8 + $0x18] sm:$0xff] }
   0xe   :  { %1049 = vmatprep.subr.bf16.mxu1 %v1157_v2  ;;  %v1326_v47 = vpack.c.bf16 %v437_v43, %v436_v42  ;;  %v1338_v54 = vpack.c.bf16 %v439_v50, %v438_v49  ;;  %v352_v61 = vld [vmem:[%s1409_s7 + $0x50] sm:$0xff]  ;;  %v353_v62 = vld [vmem:[%s1409_s7 + $0x58] sm:$0xff]  ;;  %v839_v63 = vld [vmem:[%s1408_s6] ss:$0 sm:$0xff] }
   0xf   :  { %919 = vmatmul.mubr.msk.f32.gmra.mrb[4].mxu0 %vm48_vm1, %v38_v16  ;;  %v1076_v1 = vpack.c.bf16 %v353_v62, %v352_v61  ;;  %v835_v8 = vld [vmem:[%s1411_s9] ss:$0 sm:$0xff]  ;;  %s1160_s9 = smov [#allocation2]  }
  0x10   :  { %952 = vmatprep.mubr.msk.f32.mxu0 %vm258_vm2, %v246_v24  ;;  %951 = vmatpush3.msra.mxu0 %v250_v23  ;;  %s823_s12 = sshll.u32 %s1160_s9, 4  ;;  %s824_s12 = int_to_ptr.vmem [resolvable:$true] %s823_s12 }
  0x11   :  { %1051 = vmatpush3.bf16.msra.mxu1 %v1050_v19  ;;  %1057 = vmatprep.subr.bf16.mxu0 %v1056_v28  ;;  %s1133_s13 = scalar_lea.vmem %s824_s12, 128  ;;  %p1138_p1 = scmp.lt.s32.totalorder %s824_s12, %s824_s12 }
  0x12   :  { %1080 = vmatprep.subr.bf16.mxu1 %v1157_v2  ;;  %p1134_p0 = scmp.ne.s32.totalorder %s824_s12, %s1133_s13  ;;  %p1139_p2 = scmp.lt.s32.totalorder %s1133_s13, %s1133_s13 }
  0x13   :  { %953 = vmatmul.mubr.msk.f32.vlgmr.msra.gmra.mrb[6].mxu0 %vm258_vm2, %v247_v25 }
  0x14   :  { %1059 = vmatpush3.bf16.msra.mxu0 %v1056_v28  ;;  %p1140_p3 = por %p1139_p2, %p1138_p1 }
  0x15   :  { %1061 = vmatprep.subr.bf16.mxu0 %v1060_v31 }
  0x16   :  { %p1141_p4 = pnand %p1140_p3, %p1134_p0 }
  0x18   :  { %1063 = vmatpush3.bf16.msra.mxu0 %v1060_v31 }
  0x19   :  { %1065 = vmatprep.subr.bf16.mxu0 %v1064_v34 }
  0x1c   :  { %1067 = vmatpush3.bf16.msra.mxu0 %v1064_v34 }
  0x1d   :  { %1069 = vmatprep.subr.bf16.mxu0 %v1068_v37 }
  0x20   :  { %1071 = vmatpush3.bf16.msra.mxu0 %v1068_v37 }
  0x21   :  { %1073 = vmatprep.subr.bf16.mxu0 %v1072_v40 }
  0x24   :  { %1075 = vmatpush3.bf16.msra.mxu0 %v1072_v40 }
  0x25   :  { %1077 = vmatprep.subr.bf16.mxu0 %v1076_v1 }
  0x28   :  { %1079 = vmatpush3.bf16.msra.mxu0 %v1076_v1 }
  0x29   :  { %1098 = vmatprep.subr.bf16.mxu0 %v1157_v2 }
  0xda   :  { %v124_v44 = vpop.f32.mrb[0].mxu0 }
  0xdb   :  { %v125_v45 = vadd.f32 %v831_v41, %v124_v44  ;;  %v914_v46 = vpop.f32.mrb[1].mxu0 }
  0xdd   :  { %v138_v48 = vmax.f32 %v125_v45, 0.0 }
  0xde   :  { %v129_v51 = vpop.f32.mrb[2].mxu0 }
  0xdf   :  { %v130_v52 = vadd.f32 %v831_v41, %v129_v51  ;;  %v917_v53 = vpop.f32.mrb[3].mxu0  ;;  %938 = vmatmul.mubr.msk.f32.vlgmr.msra.gmra.mrb[0].mxu1 %vm156_vm3, %v138_v48 }
  0xe0   :  { %1082 = vmatpush3.bf16.msra.mxu1 %v1326_v47  ;;  %940 = vmatprep.mubr.msk.f32.mxu1 %vm1158_vm0, %v1159_v4 }
  0xe1   :  { %v139_v55 = vmax.f32 %v130_v52, 0.0  ;;  %1083 = vmatprep.subr.bf16.mxu1 %v1157_v2 }
  0xe2   :  { %v134_v56 = vpop.f32.mrb[4].mxu0 }
  0xe3   :  { %v135_v57 = vadd.f32 %v831_v41, %v134_v56  ;;  %v920_v58 = vpop.f32.mrb[5].mxu0  ;;  %941 = vmatmul.mubr.msk.f32.gmra.mrb[2].mxu1 %vm156_vm3, %v139_v55 }
  0xe4   :  { %1085 = vmatpush3.bf16.msra.mxu1 %v1338_v54  ;;  %943 = vmatprep.mubr.msk.f32.mxu1 %vm1158_vm0, %v1159_v4 }
  0xe5   :  { %v140_v59 = vmax.f32 %v135_v57, 0.0  ;;  %1086 = vmatprep.subr.bf16.mxu1 %v1157_v2 }
  0xe6   :  { %v954_v60 = vpop.f32.mrb[6].mxu0 }
  0xe7   :  { %944 = vmatmul.mubr.msk.f32.gmra.mrb[4].mxu1 %vm156_vm3, %v140_v59  ;;  %v331_v0 = vpop.f32.mrb[7].mxu0  ;;  %v337_v3 = vadd.f32 %v954_v60, %v839_v63 }
  0xe8   :  { %990 = vmatprep.mubr.msk.f32.mxu1 %vm1158_vm0, %v1159_v4  ;;  %v332_v5 = vadd.f32 %v839_v63, %v331_v0 }
  0xe9   :  { %v341_v6 = vmax.f32 %v337_v3, 0.0 }
  0xea   :  { %v340_v7 = vmax.f32 %v332_v5, 0.0 }
  0xeb   :  { %991 = vmatmul.mubr.f32.vlgmr.msra.gmra.mrb[0].mxu1 %v1159_v4 }
  0xec   :  { %1088 = vmatpush3.bf16.msra.mxu1 %v1326_v47  ;;  %1001 = vmatprep.mubr.msk.f32.mxu1 %vm1158_vm0, %v1159_v4 }
  0xed   :  { %1089 = vmatprep.subr.bf16.mxu1 %v1157_v2  ;;  %979 = vmatprep.mubr.msk.f32.mxu0 %vm354_vm4, %v340_v7 }
  0xee   :  { %980 = vmatmul.mubr.msk.f32.vlgmr.msra.gmra.mrb[8].mxu0 %vm354_vm4, %v341_v6 }
  0xef   :  { %1100 = vmatpush3.bf16.msra.mxu0 %v1326_v47  ;;  %1023 = vmatprep.mubr.msk.f32.mxu0 %vm1158_vm0, %v1159_v4 }
  0xf0   :  { %1091 = vmatpush3.bf16.msra.mxu1 %v1338_v54  ;;  %1101 = vmatprep.subr.bf16.mxu0 %v1157_v2 }
  0xf1   :  { %1092 = vmatprep.subr.bf16.mxu1 %v1157_v2 }
  0xf3   :  { %1103 = vmatpush3.bf16.msra.mxu0 %v1338_v54 }
 0x1be   :  { %v510_v9 = vpop.f32.mrb[0].mxu1 }
 0x1bf   :  { %v1110_v10 = vadd.f32 %v835_v8, %v510_v9  ;;  %v992_v11 = vpop.f32.mrb[1].mxu1 }
 0x1c1   :  { %1123 = vtanh.f32 %v1110_v10  ;;  %v981_v13 = vpop.f32.mrb[8].mxu0 }
 0x1c2   :  { %v427_v14 = vpop.f32.mrb[9].mxu0  ;;  %v433_v24 = vadd.f32 %v981_v13, %v835_v8 }
 0x1c3   :  { %v428_v15 = vadd.f32 %v835_v8, %v427_v14 }
 0x1cb   :  { %v1124_v12 = vpop.eup %1123 }
 0x1cc   :  { %1002 = vmatmul.mubr.msk.f32.vlgmr.msra.gmra.mrb[6].mxu1 %vm440_vm5, %v1124_v12 }
 0x1cd   :  { %1094 = vmatpush3.bf16.msra.mxu1 %v1326_v47  ;;  %1012 = vmatprep.mubr.msk.f32.mxu1 %vm1158_vm0, %v1159_v4 }
 0x1ce   :  { %1095 = vmatprep.subr.bf16.mxu1 %v1157_v2 }
 0x1d1   :  { %1097 = vmatpush3.bf16.msra.mxu1 %v1338_v54 }
 0x1d2   :  { %1104 = vmatprep.subr.bf16.mxu1 %v1157_v2 }
 0x29f   :  { %v585_v16 = vpop.f32.mrb[6].mxu1 }
 0x2a0   :  { %v589_v17 = vadd.f32 %v585_v16, %v428_v15  ;;  %v1003_v18 = vpop.f32.mrb[7].mxu1 }
 0x2a2   :  { %1125 = vtanh.f32 %v589_v17 }
 0x2ac   :  { %v1126_v19 = vpop.eup %1125 }
 0x2ad   :  { %1013 = vmatmul.mubr.msk.f32.vlgmr.msra.gmra.mrb[2].mxu1 %vm440_vm5, %v1126_v19 }
 0x2ae   :  { %1106 = vmatpush3.bf16.msra.mxu1 %v1326_v47  ;;  %1034 = vmatprep.mubr.msk.f32.mxu1 %vm1158_vm0, %v1159_v4 }
 0x2af   :  { %1107 = vmatprep.subr.bf16.mxu1 %v1157_v2 }
 0x2b2   :  { %1109 = vmatpush3.bf16.msra.mxu1 %v1338_v54 }
 0x380   :  { %v660_v20 = vpop.f32.mrb[2].mxu1 }
 0x381   :  { %v1111_v21 = vadd.f32 %v835_v8, %v660_v20  ;;  %v1014_v22 = vpop.f32.mrb[3].mxu1 }
 0x383   :  { %1127 = vtanh.f32 %v1111_v21 }
 0x38d   :  { %v1128_v23 = vpop.eup %1127 }
 0x38e   :  { %1024 = vmatmul.mubr.msk.f32.vlgmr.msra.gmra.mrb[10].mxu0 %vm440_vm5, %v1128_v23 }
 0x461   :  { %v735_v25 = vpop.f32.mrb[10].mxu0 }
 0x462   :  { %v739_v26 = vadd.f32 %v735_v25, %v433_v24  ;;  %v1025_v27 = vpop.f32.mrb[11].mxu0 }
 0x464   :  { %1129 = vtanh.f32 %v739_v26 }
 0x46e   :  { %v1130_v28 = vpop.eup %1129 }
 0x46f   :  { %1035 = vmatmul.mubr.msk.f32.vlgmr.msra.gmra.mrb[4].mxu1 %vm440_vm5, %v1130_v28 }
 0x542   :  { %v810_v4 = vpop.f32.mrb[4].mxu1 }
 0x543   :  { %v1112_v29 = vadd.f32 %v835_v8, %v810_v4  ;;  %v1036_v2 = vpop.f32.mrb[5].mxu1 }
 0x545   :  { %1131 = vtanh.f32 %v1112_v29 }
 0x54f   :  { %v1132_v30 = vpop.eup %1131 }
 0x550   :  { %816 = vst.msk [vmem:[#allocation2] sm:$0xff] %vm440_vm5, %v1132_v30 }
 0x551   :  { %1144 = shalt.err (!%p1141_p4)
}
 0x552   :  { %s1145_s16 = scalar_lea.hbm %s1412_s10, 128 }
 0x553   :  { %p1146_p5 = scmp.ne.s32.totalorder %s1412_s10, %s1145_s16  ;;  %p1149_p6 = scmp.lt.u32.totalorder %s1145_s16, %s1412_s10 }
 0x555   :  { %p1151_p7 = pnand %p1149_p6, %p1146_p5 }
 0x557   :  { %1154 = shalt.err (!%p1151_p7)
}
 0x558   :  { %826 = dma.vmem_to_hbm [thread:$0]  %s824_s12, 128, %s1412_s10, [#allocation3]  }
 0x559   :  { %1155 = dma.done.wait [#allocation3], 128  }
 0x55a   :  { %1156 = vsyncadd [#allocation3], 4294967168 }
 0x55b   :  { %830 = vsyncpa [#allocation3], 1 }

</bundles_post_ra>
